<compile_context>
chip_gen: v7x
topology: tpu7x:2x2x1
jax: 0.10.0
libtpu: 0.0.40
codegen_flags: <defaults>
</compile_context>

<pallas_src>
import functools
import math

import jax
import jax.numpy as jnp
from jax import lax
from jax.experimental import pallas as pl
from jax.experimental.pallas import tpu as pltpu


def _round_up(x, m):
    return ((x + m - 1) // m) * m


# ---------------------------------------------------------------------------
# Phase 1: hoisted input projection  pre_gates = x_flat @ W_ih^T + b
# ---------------------------------------------------------------------------
def _input_proj_kernel(x_ref, w_ref, b_ref, o_ref):
    o_ref[...] = (
        jnp.dot(x_ref[...], w_ref[...], preferred_element_type=jnp.float32)
        + b_ref[...]
    ).astype(o_ref.dtype)


def _input_projection(x_flat, w_ih_t, b):
    """x_flat: (R, I); w_ih_t: (I, 4H); b: (1, 4H)  ->  (R, 4H) float32."""
    R, I = x_flat.shape
    four_h = w_ih_t.shape[1]

    rm = min(256, _round_up(R, 8))          # row tile, multiple of 8 sublanes
    r_pad = _round_up(R, rm)
    if r_pad != R:
        x_flat = jnp.pad(x_flat, ((0, r_pad - R), (0, 0)))

    out = pl.pallas_call(
        _input_proj_kernel,
        out_shape=jax.ShapeDtypeStruct((r_pad, four_h), jnp.float32),
        grid_spec=pltpu.PrefetchScalarGridSpec(
            num_scalar_prefetch=0,
            grid=(r_pad // rm,),
            in_specs=[
                pl.BlockSpec((rm, I), lambda r: (r, 0)),        # x row tile
                pl.BlockSpec((I, four_h), lambda r: (0, 0)),    # W_ih^T resident
                pl.BlockSpec((1, four_h), lambda r: (0, 0)),    # folded bias resident
            ],
            out_specs=pl.BlockSpec((rm, four_h), lambda r: (r, 0)),
        ),
        compiler_params=pltpu.CompilerParams(
            dimension_semantics=("parallel",),   # independent row tiles
        ),
    )(x_flat, w_ih_t, b)
    return out[:R]


# ---------------------------------------------------------------------------
# Phase 2: recurrent kernel over time chunks
# ---------------------------------------------------------------------------
def _lstm_recurrent_kernel(pg_ref, whh_ref, out_ref, cn_ref, h_sc, c_sc,
                           *, tile_t, seq_len):
    chunk = pl.program_id(0)

    # h_0 / c_0 default to zeros (PyTorch forward with h_0=c_0=None).
    @pl.when(chunk == 0)
    def _():
        h_sc[...] = jnp.zeros_like(h_sc)
        c_sc[...] = jnp.zeros_like(c_sc)

    hidden = h_sc.shape[-1]
    whh = whh_ref[...]                       # (H, 4H) -- hoisted out of the loop
    needs_mask = (seq_len % tile_t) != 0     # trace-time branch (remainder chunk)

    def step(t, carry):
        h, c = carry
        # pre_gates already holds x_t @ W_ih^T + (b_ih + b_hh); only the
        # hidden projection remains on the per-step critical path.
        gates = pg_ref[t] + jnp.dot(h, whh, preferred_element_type=jnp.float32)

        # NOTE: for H % 128 == 0 these slices are lane-tile aligned (free).
        i = jax.nn.sigmoid(gates[:, 0 * hidden:1 * hidden])
        f = jax.nn.sigmoid(gates[:, 1 * hidden:2 * hidden])
        g = jnp.tanh(gates[:, 2 * hidden:3 * hidden])
        o = jax.nn.sigmoid(gates[:, 3 * hidden:4 * hidden])

        c_new = f * c + i * g
        h_new = o * jnp.tanh(c_new)

        if needs_mask:
            # Freeze the state on zero-padded timesteps of the last chunk.
            valid = (chunk * tile_t + t) < seq_len
            c_new = jnp.where(valid, c_new, c)
            h_new = jnp.where(valid, h_new, h)

        # Accumulate into the chunk's VMEM output block; the HBM writeback is
        # one dense (tile_t, B, H) slab per grid step.
        out_ref[t] = h_new.astype(out_ref.dtype)
        return (h_new, c_new)

    h, c = lax.fori_loop(0, tile_t, step, (h_sc[...], c_sc[...]), unroll=True)

    h_sc[...] = h
    c_sc[...] = c

    # c_n is a resident output block; finalize it only on the last chunk to
    # avoid a per-chunk (B, H) store.
    @pl.when(chunk == pl.num_programs(0) - 1)
    def _():
        cn_ref[...] = c.astype(cn_ref.dtype)


def lstm_forward(x, w_ih, w_hh, b_ih, b_hh, *, time_tile=8):
    """x: (T, B, I); w_ih: (4H, I); w_hh: (4H, H); b_ih, b_hh: (4H,)."""
    T, B, I = x.shape
    four_h = w_ih.shape[0]
    H = four_h // 4

    # TODO(synk): for production sizes on v6e/v7x, cast x / W_ih^T / W_hh^T to
    # bfloat16 (keeping f32 accumulation and f32 h/c state); kept f32 here so
    # the script's tight correctness check against the f32 reference holds.
    dtype = jnp.float32
    w_ih_t = jnp.asarray(w_ih, dtype).T                       # (I, 4H)
    w_hh_t = jnp.asarray(w_hh, dtype).T                       # (H, 4H)
    b = (jnp.asarray(b_ih, jnp.float32)
         + jnp.asarray(b_hh, jnp.float32)).reshape(1, four_h)  # folded bias

    tile_t = max(1, min(time_tile, T))
    n_chunks = (T + tile_t - 1) // tile_t
    t_pad = n_chunks * tile_t

    x_p = jnp.asarray(x, dtype)
    if t_pad != T:
        x_p = jnp.pad(x_p, ((0, t_pad - T), (0, 0), (0, 0)))

    # Phase 1: one large matmul for the whole (padded) sequence.
    pre_gates = _input_projection(x_p.reshape(t_pad * B, I), w_ih_t, b)
    pre_gates = pre_gates.reshape(t_pad, B, four_h)

    kernel = functools.partial(_lstm_recurrent_kernel,
                               tile_t=tile_t, seq_len=T)

    out_shapes = (
        jax.ShapeDtypeStruct((t_pad, B, H), jnp.float32),     # hidden states
        jax.ShapeDtypeStruct((B, H), jnp.float32),            # c_n
    )

    grid_spec = pltpu.PrefetchScalarGridSpec(
        num_scalar_prefetch=0,
        grid=(n_chunks,),
        in_specs=[
            pl.BlockSpec((tile_t, B, four_h), lambda c: (c, 0, 0)),  # pre_gates chunk
            pl.BlockSpec((H, four_h), lambda c: (0, 0)),             # W_hh^T resident
        ],
        out_specs=[
            pl.BlockSpec((tile_t, B, H), lambda c: (c, 0, 0)),       # output chunk
            pl.BlockSpec((B, H), lambda c: (0, 0)),                  # c_n resident
        ],
        scratch_shapes=[
            pltpu.VMEM((B, H), jnp.float32),                         # h state
            pltpu.VMEM((B, H), jnp.float32),                         # c state
        ],
    )

    output_pad, c_n = pl.pallas_call(
        kernel,
        out_shape=out_shapes,
        grid_spec=grid_spec,
        compiler_params=pltpu.CompilerParams(
            dimension_semantics=("arbitrary",),    # time is sequential
        ),
    )(pre_gates, w_hh_t)

    output = output_pad[:T]
    h_n = output[T - 1]                            # h_n == last hidden state
    # Match PyTorch return convention: (output, (h_n, c_n)), num_layers = 1.
    return output, (h_n[None, :, :], c_n[None, :, :])


def init_lstm_params(key, input_size, hidden_size):
    """Deterministic uniform(-1/sqrt(H), 1/sqrt(H)) init, matching init_params()."""
    bound = math.sqrt(1.0 / hidden_size)
    k1, k2, k3, k4 = jax.random.split(key, 4)
    w_ih = jax.random.uniform(k1, (4 * hidden_size, input_size),
                              minval=-bound, maxval=bound, dtype=jnp.float32)
    w_hh = jax.random.uniform(k2, (4 * hidden_size, hidden_size),
                              minval=-bound, maxval=bound, dtype=jnp.float32)
    b_ih = jax.random.uniform(k3, (4 * hidden_size,),
                              minval=-bound, maxval=bound, dtype=jnp.float32)
    b_hh = jax.random.uniform(k4, (4 * hidden_size,),
                              minval=-bound, maxval=bound, dtype=jnp.float32)
    return w_ih, w_hh, b_ih, b_hh


def _lstm_reference(x, w_ih, w_hh, b_ih, b_hh):
    """Pure-JAX reference of the same forward (f32, highest matmul precision)."""
    T, B, I = x.shape
    H = w_hh.shape[1]
    hp = lax.Precision.HIGHEST
    h = jnp.zeros((B, H), jnp.float32)
    c = jnp.zeros((B, H), jnp.float32)
    outs = []
    for t in range(T):
        gates = (jnp.dot(x[t], w_ih.T, precision=hp)
                 + jnp.dot(h, w_hh.T, precision=hp) + b_ih + b_hh)
        i = jax.nn.sigmoid(gates[:, 0 * H:1 * H])
        f = jax.nn.sigmoid(gates[:, 1 * H:2 * H])
        g = jnp.tanh(gates[:, 2 * H:3 * H])
        o = jax.nn.sigmoid(gates[:, 3 * H:4 * H])
        c = f * c + i * g
        h = o * jnp.tanh(c)
        outs.append(h)
    return jnp.stack(outs), h, c


if __name__ == "__main__":
    # Small shapes: seq=8, batch=2, input_size=16, hidden_size=32
    seq_len, batch, input_size, hidden_size = 8, 2, 16, 32

    key = jax.random.PRNGKey(0)
    k_x, k_p = jax.random.split(key)
    x = jax.random.normal(k_x, (seq_len, batch, input_size), dtype=jnp.float32)
    w_ih, w_hh, b_ih, b_hh = init_lstm_params(k_p, input_size, hidden_size)

    ref_out, ref_h, ref_c = _lstm_reference(x, w_ih, w_hh, b_ih, b_hh)

    # Exercise both the even-chunking path (tile 4 divides 8) and the
    # remainder-masking path (tile 5 does not divide 8, needs padded steps).
    for tt in (4, 5):
        output, (h_n, c_n) = lstm_forward(x, w_ih, w_hh, b_ih, b_hh, time_tile=tt)
        jax.block_until_ready((output, h_n, c_n))

        assert output.shape == (seq_len, batch, hidden_size)
        assert h_n.shape == (1, batch, hidden_size)
        assert c_n.shape == (1, batch, hidden_size)

        assert jnp.allclose(output, ref_out, atol=1e-4, rtol=1e-4)
        assert jnp.allclose(h_n[0], ref_h, atol=1e-4, rtol=1e-4)
        assert jnp.allclose(c_n[0], ref_c, atol=1e-4, rtol=1e-4)

    print("KERNEL_OK")
</pallas_src>

<mosaic_0001>
module attributes {stable_mosaic.version = 11 : i64} {
  func.func @_input_proj_kernel(%arg0: i32, %arg1: memref<16x16xf32, #tpu.memory_space<vmem>>, %arg2: memref<16x128xf32, #tpu.memory_space<vmem>>, %arg3: memref<1x128xf32, #tpu.memory_space<vmem>>, %arg4: memref<16x128xf32, #tpu.memory_space<vmem>>) attributes {dimension_semantics = [#tpu.dimension_semantics<parallel>], iteration_bounds = array<i64: 1>, scalar_prefetch = 0 : i64, scratch_operands = 0 : i64, tpu.core_type = #tpu.core_type<tc>, window_params = [{transform_indices = @transform_0, window_bounds = array<i64: 16, 16>}, {pipeline_mode = #tpu.pipeline_mode<synchronous>, transform_indices = @transform_1, window_bounds = array<i64: 16, 128>}, {pipeline_mode = #tpu.pipeline_mode<synchronous>, transform_indices = @transform_2, window_bounds = array<i64: 1, 128>}, {transform_indices = @transform_3, window_bounds = array<i64: 16, 128>}]} {
    %c0 = arith.constant 0 : index
    %c0_0 = arith.constant 0 : index
    %0 = vector.load %arg1[%c0, %c0_0] : memref<16x16xf32, #tpu.memory_space<vmem>>, vector<16x16xf32>
    %c0_1 = arith.constant 0 : index
    %c0_2 = arith.constant 0 : index
    %1 = vector.load %arg2[%c0_1, %c0_2] : memref<16x128xf32, #tpu.memory_space<vmem>>, vector<16x128xf32>
    %cst = arith.constant dense<0.000000e+00> : vector<16x128xf32>
    %2 = tpu.matmul %0, %1, %cst {dimension_numbers = #tpu.dot_dimension_numbers<[1], [0], [0], [1], [0, 0, 1, 1], [], []>} : vector<16x16xf32>, vector<16x128xf32>, vector<16x128xf32> -> vector<16x128xf32>
    %c0_3 = arith.constant 0 : index
    %c0_4 = arith.constant 0 : index
    %3 = vector.load %arg3[%c0_3, %c0_4] : memref<1x128xf32, #tpu.memory_space<vmem>>, vector<1x128xf32>
    %4 = vector.broadcast %3 : vector<1x128xf32> to vector<16x128xf32>
    %5 = arith.addf %2, %4 : vector<16x128xf32>
    %c0_5 = arith.constant 0 : index
    %c0_6 = arith.constant 0 : index
    %6 = vector.load %arg4[%c0_5, %c0_6] : memref<16x128xf32, #tpu.memory_space<vmem>>, vector<16x128xf32>
    tpu.vector_store %arg4[%c0_5, %c0_6], %5 {strides = array<i32>} : memref<16x128xf32, #tpu.memory_space<vmem>>, vector<16x128xf32>,
    return
  }
  func.func @transform_0(%arg0: i32) -> (i32, i32) {
    %c0_i32 = arith.constant 0 : i32
    %c0_i32_0 = arith.constant 0 : i32
    return %arg0, %c0_i32 : i32, i32
  }
  func.func @transform_1(%arg0: i32) -> (i32, i32) {
    %c0_i32 = arith.constant 0 : i32
    %c0_i32_0 = arith.constant 0 : i32
    %c0_i32_1 = arith.constant 0 : i32
    return %c0_i32, %c0_i32_0 : i32, i32
  }
  func.func @transform_2(%arg0: i32) -> (i32, i32) {
    %c0_i32 = arith.constant 0 : i32
    %c0_i32_0 = arith.constant 0 : i32
    %c0_i32_1 = arith.constant 0 : i32
    return %c0_i32, %c0_i32_0 : i32, i32
  }
  func.func @transform_3(%arg0: i32) -> (i32, i32) {
    %c0_i32 = arith.constant 0 : i32
    %c0_i32_0 = arith.constant 0 : i32
    return %arg0, %c0_i32 : i32, i32
  }
}

</mosaic_0001>

<bundles_post_ra>
// kernel: tpu_custom_call.1
= control target key start
LH: loop header
LB: loop body
LE: loop exit
PB: predicated region body
PF: predicated region fallthrough
CT: control target
= control target key end

     0   :  { %8 = vsyncpa [#allocation3], 0  ;;  %s324_s0 = inlined_call_operand.hbm [shape: f32[16,16], index: 0, kind: input, shape index: {}]   ;;  %s325_s1 = inlined_call_operand.hbm [shape: f32[16,128], index: 1, kind: input, shape index: {}]   ;;  %s326_s2 = inlined_call_operand.vmem [shape: f32[1,128], index: 2, kind: input, shape index: {}]   ;;  %s327_s3 = inlined_call_operand.hbm [shape: f32[16,128], index: 3, kind: output, shape index: {}]  }
   0x1   :  { %9 = vsyncpa [#allocation6], 0 }
   0x2   :  { %10 = vsyncpa [#allocation4], 0  ;;  %s251_s12 = smov [#allocation2]   ;;  %s179_s16 = scalar_lea.hbm %s324_s0, 256 }
   0x3   :  { %s16_s13 = sshll.u32 %s251_s12, 4  ;;  %p180_p0 = scmp.ne.s32.totalorder %s324_s0, %s179_s16  ;;  %s17_s13 = int_to_ptr.vmem [resolvable:$true] %s16_s13 }
   0x4   :  { %p183_p1 = scmp.lt.u32.totalorder %s179_s16, %s324_s0 }
   0x6   :  { %p185_p2 = pnand %p183_p1, %p180_p0 }
   0x8   :  { %188 = shalt.err (!%p185_p2)
}
   0x9   :  { %s189_s21 = scalar_lea.vmem %s17_s13, 256  ;;  %p194_p4 = scmp.lt.s32.totalorder %s17_s13, %s17_s13 }
   0xa   :  { %p190_p3 = scmp.ne.s32.totalorder %s17_s13, %s189_s21  ;;  %p195_p5 = scmp.lt.s32.totalorder %s189_s21, %s189_s21 }
   0xc   :  { %p196_p6 = por %p195_p5, %p194_p4 }
   0xe   :  { %p197_p7 = pnand %p196_p6, %p190_p3 }
  0x10   :  { %200 = shalt.err (!%p197_p7)
}
  0x11   :  { %s252_s22 = smov 128   ;;  %s253_s23 = smov 8  }
  0x12   :  { %22 = dma.hbm_to_vmem [thread:$0]  %s324_s0, 256, %s17_s13, [#allocation3], %s252_s22, %s252_s22, %s253_s23  }
  0x13   :  { %s254_s26 = smov [#allocation5]   ;;  %s201_s30 = scalar_lea.hbm %s325_s1, 256 }
  0x14   :  { %s28_s27 = sshll.u32 %s254_s26, 4  ;;  %p202_p8 = scmp.ne.s32.totalorder %s325_s1, %s201_s30  ;;  %s29_s27 = int_to_ptr.vmem [resolvable:$true] %s28_s27 }
  0x15   :  { %p205_p9 = scmp.lt.u32.totalorder %s201_s30, %s325_s1 }
  0x17   :  { %p207_p10 = pnand %p205_p9, %p202_p8 }
  0x19   :  { %210 = shalt.err (!%p207_p10)
}
  0x1a   :  { %s211_s8 = scalar_lea.vmem %s29_s27, 256  ;;  %p216_p12 = scmp.lt.s32.totalorder %s29_s27, %s29_s27 }
  0x1b   :  { %p212_p11 = scmp.ne.s32.totalorder %s29_s27, %s211_s8  ;;  %p217_p13 = scmp.lt.s32.totalorder %s211_s8, %s211_s8 }
  0x1d   :  { %p218_p0 = por %p217_p13, %p216_p12 }
  0x1f   :  { %p219_p1 = pnand %p218_p0, %p212_p11 }
  0x21   :  { %222 = shalt.err (!%p219_p1)
}
  0x22   :  { %34 = dma.hbm_to_vmem [thread:$0]  %s325_s1, 256, %s29_s27, [#allocation6], %s252_s22, %s252_s22, %s253_s23  }
  0x23   :  { %245 = dma.done.wait [#allocation3], 256  }
  0x24   :  { %246 = vsyncadd [#allocation3], 4294967040 }
  0x25   :  { %247 = dma.done.wait [#allocation6], 256  }
  0x26   :  { %248 = vsyncadd [#allocation6], 4294967040  ;;  %vm54_vm0 = vcmask 130048   ;;  %v45_v0 = vld [vmem:[#allocation5] sm:$0xff]  ;;  %v46_v1 = vld [vmem:[#allocation5 + $0x8] sm:$0xff]  ;;  %s255_s12 = smov [#allocation7]  }
  0x27   :  { %v43_v2 = vld [vmem:[#allocation2] sm:$0xff]  ;;  %v170_v3 = vpack.c.bf16 %v46_v1, %v45_v0  ;;  %v44_v4 = vld [vmem:[#allocation2 + $0x8] sm:$0xff]  ;;  %s143_s1 = sshll.u32 %s255_s12, 4  ;;  %s144_s1 = int_to_ptr.vmem [resolvable:$true] %s143_s1 }
  0x28   :  { %167 = vmatprep.mubr.msk.f32.mxu0 %vm54_vm0, %v43_v2  ;;  %v156_v5 = vld [vmem:[%s326_s2] ss:$0 sm:$0xff]  ;;  %s223_s13 = scalar_lea.vmem %s144_s1, 256  ;;  %p228_p3 = scmp.lt.s32.totalorder %s144_s1, %s144_s1 }
  0x29   :  { %171 = vmatprep.subr.bf16.mxu0 %v170_v3  ;;  %p224_p2 = scmp.ne.s32.totalorder %s144_s1, %s223_s13  ;;  %p229_p4 = scmp.lt.s32.totalorder %s223_s13, %s223_s13 }
  0x2a   :  { %173 = vmatpush3.bf16.msra.mxu0 %v170_v3 }
  0x2b   :  { %p230_p5 = por %p229_p4, %p228_p3 }
  0x2d   :  { %168 = vmatmul.mubr.msk.f32.vlgmr.msra.gmra.mrb[0].mxu0 %vm54_vm0, %v44_v4  ;;  %p231_p6 = pnand %p230_p5, %p224_p2 }
 0x100   :  { %v169_v6 = vpop.f32.mrb[0].mxu0 }
 0x101   :  { %v133_v7 = vadd.f32 %v169_v6, %v156_v5  ;;  %v127_v8 = vpop.f32.mrb[1].mxu0 }
 0x102   :  { %v128_v9 = vadd.f32 %v156_v5, %v127_v8 }
 0x103   :  { %137 = vst [vmem:[#allocation7 + $0x8] sm:$0xff] %v133_v7 }
 0x104   :  { %136 = vst [vmem:[#allocation7] sm:$0xff] %v128_v9 }
 0x105   :  { %234 = shalt.err (!%p231_p6)
}
 0x106   :  { %s235_s2 = scalar_lea.hbm %s327_s3, 256 }
 0x107   :  { %p236_p7 = scmp.ne.s32.totalorder %s327_s3, %s235_s2  ;;  %p239_p8 = scmp.lt.u32.totalorder %s235_s2, %s327_s3 }
 0x109   :  { %p241_p9 = pnand %p239_p8, %p236_p7 }
 0x10b   :  { %244 = shalt.err (!%p241_p9)
}
 0x10c   :  { %149 = dma.vmem_to_hbm [thread:$0]  %s144_s1, 256, %s327_s3, [#allocation4], %s252_s22, %s252_s22, %s253_s23  }
 0x10d   :  { %249 = dma.done.wait [#allocation4], 256  }
 0x10e   :  { %250 = vsyncadd [#allocation4], 4294967040 }
 0x10f   :  { %153 = vsyncpa [#allocation3], 1 }
 0x110   :  { %154 = vsyncpa [#allocation6], 1 }
 0x111   :  { %155 = vsyncpa [#allocation4], 1 }

</bundles_post_ra>
